<compile_context>
chip_gen: v6e
topology: v6e:2x2x1
jax: 0.10.0
libtpu: 0.0.40
codegen_flags: <defaults>
</compile_context>

<pallas_src>
import jax
import jax.numpy as jnp
from jax.experimental import pallas as pl
from jax.experimental.pallas import tpu as pltpu

OUT_PAD = 128  # lane-dense padded width of the value head (real output is column 0)


def _round_up(x, m):
    return ((x + m - 1) // m) * m


# ----------------------------- Pallas kernel ------------------------------ #
def critic_mlp_kernel(x_ref, w1_ref, b1_ref, w2_ref, b2_ref, w3_ref, b3_ref, o_ref):
    # x: [TB, D_in] bf16 block of the (padded) observation batch.
    x = x_ref[...]

    # Hidden layer 1: bf16 MXU matmul, f32 accumulate, f32 bias + ReLU on the VPU.
    h = jnp.dot(x, w1_ref[...], preferred_element_type=jnp.float32) + b1_ref[...]
    h = jnp.maximum(h, 0.0)

    # Hidden layer 2.
    h = jnp.dot(h.astype(jnp.bfloat16), w2_ref[...],
                preferred_element_type=jnp.float32) + b2_ref[...]
    h = jnp.maximum(h, 0.0)

    # Value head: Linear(layer_size -> 1) padded to 128 lanes so the last matmul
    # is a full MXU tile and the store is a lane-dense, unmasked vst.
    out = jnp.dot(h.astype(jnp.bfloat16), w3_ref[...],
                  preferred_element_type=jnp.float32) + b3_ref[...]

    o_ref[...] = out.astype(o_ref.dtype)  # [TB, 128]; column 0 holds the value.


# ------------------------------ wrapper ----------------------------------- #
def critic_forward(observations, params, *, batch_tile=1024):
    """observations: [B, obs_dim] float32 -> returns [B] float32 (state values)."""
    w1, b1, w2, b2, w3, b3 = params
    B, D = observations.shape
    H = w1.shape[1]

    # bf16 matmul operands (f32 accumulation happens on the MXU inside the kernel).
    x = observations.astype(jnp.bfloat16)
    w1b = w1.astype(jnp.bfloat16)
    w2b = w2.astype(jnp.bfloat16)
    # Lane-dense value head: pad (H, 1)/(1, 1) -> (H, 128)/(1, 128) with zeros.
    w3p = jnp.pad(w3, ((0, 0), (0, OUT_PAD - w3.shape[1]))).astype(jnp.bfloat16)
    b3p = jnp.pad(b3, ((0, 0), (0, OUT_PAD - b3.shape[1]))).astype(jnp.float32)
    b1f = b1.astype(jnp.float32)
    b2f = b2.astype(jnp.float32)

    # Batch tile: multiple of 16 (bf16 sublane packing), capped so a double-buffered
    # pipeline stays tiny even against v7x's 64 MiB VMEM.
    tb = _round_up(min(batch_tile, _round_up(B, 16)), 16)
    Bp = _round_up(B, tb)
    if Bp != B:
        x = jnp.pad(x, ((0, Bp - B), (0, 0)))
    grid = (Bp // tb,)

    flops = 2 * Bp * (D * H + H * H + H * OUT_PAD)
    bytes_accessed = (
        Bp * D * 2                                   # bf16 observations
        + (w1b.size + w2b.size + w3p.size) * 2       # bf16 weights
        + (b1f.size + b2f.size + b3p.size) * 4       # f32 biases
        + Bp * OUT_PAD * 4                           # f32 padded output
    )

    out = pl.pallas_call(
        critic_mlp_kernel,
        out_shape=jax.ShapeDtypeStruct((Bp, OUT_PAD), jnp.float32),
        grid=grid,
        in_specs=[
            pl.BlockSpec((tb, D), lambda i: (i, 0)),       # observations: tiled over batch
            pl.BlockSpec(w1b.shape, lambda i: (0, 0)),     # weights/biases: VMEM-resident
            pl.BlockSpec(b1f.shape, lambda i: (0, 0)),
            pl.BlockSpec(w2b.shape, lambda i: (0, 0)),
            pl.BlockSpec(b2f.shape, lambda i: (0, 0)),
            pl.BlockSpec(w3p.shape, lambda i: (0, 0)),
            pl.BlockSpec(b3p.shape, lambda i: (0, 0)),
        ],
        out_specs=pl.BlockSpec((tb, OUT_PAD), lambda i: (i, 0)),
        compiler_params=pltpu.CompilerParams(
            dimension_semantics=("parallel",),             # v7x: shard batch over both TCs
            vmem_limit_bytes=32 * 1024 * 1024,             # headroom under v7x 64 MiB VMEM
        ),
        cost_estimate=pl.CostEstimate(
            flops=flops, transcendentals=0, bytes_accessed=bytes_accessed),
    )(x, w1b, b1f, w2b, b2f, w3p, b3p)

    # PyTorch: self.network(observations).squeeze()  -> ndim == 1
    return out[:B, 0]


# --------------------------- parameter init -------------------------------- #
def init_critic_params(key, obs_dim, layer_size):
    """Synthetic init for: Linear(obs_dim, H), Linear(H, H), Linear(H, 1)."""
    k1, k2, k3 = jax.random.split(key, 3)
    scale1 = 1.0 / jnp.sqrt(obs_dim)
    scale2 = 1.0 / jnp.sqrt(layer_size)
    w1 = jax.random.normal(k1, (obs_dim, layer_size), jnp.float32) * scale1
    b1 = jnp.zeros((1, layer_size), jnp.float32)
    w2 = jax.random.normal(k2, (layer_size, layer_size), jnp.float32) * scale2
    b2 = jnp.zeros((1, layer_size), jnp.float32)
    w3 = jax.random.normal(k3, (layer_size, 1), jnp.float32) * scale2
    b3 = jnp.zeros((1, 1), jnp.float32)
    return (w1, b1, w2, b2, w3, b3)


# Pure-JAX reference mirroring the kernel's bf16-operand / f32-accumulate path.
def critic_forward_ref(x, params):
    w1, b1, w2, b2, w3, b3 = params
    h = jnp.dot(x.astype(jnp.bfloat16), w1.astype(jnp.bfloat16),
                preferred_element_type=jnp.float32) + b1
    h = jnp.maximum(h, 0.0)
    h = jnp.dot(h.astype(jnp.bfloat16), w2.astype(jnp.bfloat16),
                preferred_element_type=jnp.float32) + b2
    h = jnp.maximum(h, 0.0)
    out = jnp.dot(h.astype(jnp.bfloat16), w3.astype(jnp.bfloat16),
                  preferred_element_type=jnp.float32) + b3
    return out[:, 0]


if __name__ == "__main__":
    # Small shapes consistent with the module:
    # batch=8 observations, obs_dim=16, config.layer_size=32, config.n_layers=2.
    # TODO(synk): update_value (Adam + MSE backward) is training logic, not part of forward.
    B, OBS_DIM, LAYER_SIZE = 8, 16, 32

    key = jax.random.PRNGKey(0)
    k_obs, k_params, k_big = jax.random.split(key, 3)
    observations = jax.random.normal(k_obs, (B, OBS_DIM), jnp.float32)
    params = init_critic_params(k_params, OBS_DIM, LAYER_SIZE)

    values = critic_forward(observations, params)
    values = jax.block_until_ready(values)
    assert values.ndim == 1 and values.shape == (B,), values.shape

    ref = critic_forward_ref(observations, params)
    assert jnp.allclose(values, ref, atol=1e-3, rtol=1e-3), (values, ref)

    # Second check: non-multiple batch with a multi-step tiled grid (grid = 3).
    B2 = 300
    obs2 = jax.random.normal(k_big, (B2, OBS_DIM), jnp.float32)
    values2 = jax.block_until_ready(critic_forward(obs2, params, batch_tile=128))
    ref2 = critic_forward_ref(obs2, params)
    assert values2.shape == (B2,), values2.shape
    assert jnp.allclose(values2, ref2, atol=1e-3, rtol=1e-3)

    print("KERNEL_OK")
</pallas_src>

<mosaic_0001>
module attributes {stable_mosaic.version = 11 : i64} {
  func.func @critic_mlp_kernel(%arg0: i32, %arg1: memref<16x16xbf16, #tpu.memory_space<vmem>>, %arg2: memref<16x32xbf16, #tpu.memory_space<vmem>>, %arg3: memref<1x32xf32, #tpu.memory_space<vmem>>, %arg4: memref<32x32xbf16, #tpu.memory_space<vmem>>, %arg5: memref<1x32xf32, #tpu.memory_space<vmem>>, %arg6: memref<32x128xbf16, #tpu.memory_space<vmem>>, %arg7: memref<1x128xf32, #tpu.memory_space<vmem>>, %arg8: memref<16x128xf32, #tpu.memory_space<vmem>>) attributes {dimension_semantics = [#tpu.dimension_semantics<parallel>], iteration_bounds = array<i64: 1>, scalar_prefetch = 0 : i64, scratch_operands = 0 : i64, tpu.core_type = #tpu.core_type<tc>, window_params = [{transform_indices = @transform_0, window_bounds = array<i64: 16, 16>}, {pipeline_mode = #tpu.pipeline_mode<synchronous>, transform_indices = @transform_1, window_bounds = array<i64: 16, 32>}, {pipeline_mode = #tpu.pipeline_mode<synchronous>, transform_indices = @transform_2, window_bounds = array<i64: 1, 32>}, {pipeline_mode = #tpu.pipeline_mode<synchronous>, transform_indices = @transform_3, window_bounds = array<i64: 32, 32>}, {pipeline_mode = #tpu.pipeline_mode<synchronous>, transform_indices = @transform_4, window_bounds = array<i64: 1, 32>}, {pipeline_mode = #tpu.pipeline_mode<synchronous>, transform_indices = @transform_5, window_bounds = array<i64: 32, 128>}, {pipeline_mode = #tpu.pipeline_mode<synchronous>, transform_indices = @transform_6, window_bounds = array<i64: 1, 128>}, {transform_indices = @transform_7, window_bounds = array<i64: 16, 128>}]} {
    %c0 = arith.constant 0 : index
    %c0_0 = arith.constant 0 : index
    %0 = vector.load %arg1[%c0, %c0_0] : memref<16x16xbf16, #tpu.memory_space<vmem>>, vector<16x16xbf16>
    %c0_1 = arith.constant 0 : index
    %c0_2 = arith.constant 0 : index
    %1 = vector.load %arg2[%c0_1, %c0_2] : memref<16x32xbf16, #tpu.memory_space<vmem>>, vector<16x32xbf16>
    %cst = arith.constant dense<0.000000e+00> : vector<16x32xf32>
    %2 = tpu.matmul %0, %1, %cst {dimension_numbers = #tpu.dot_dimension_numbers<[1], [0], [0], [1], [0, 0, 1, 1], [], []>} : vector<16x16xbf16>, vector<16x32xbf16>, vector<16x32xf32> -> vector<16x32xf32>
    %c0_3 = arith.constant 0 : index
    %c0_4 = arith.constant 0 : index
    %3 = vector.load %arg3[%c0_3, %c0_4] : memref<1x32xf32, #tpu.memory_space<vmem>>, vector<1x32xf32>
    %4 = vector.broadcast %3 : vector<1x32xf32> to vector<16x32xf32>
    %5 = arith.addf %2, %4 : vector<16x32xf32>
    %cst_5 = arith.constant 0.000000e+00 : f32
    %6 = vector.broadcast %cst_5 : f32 to vector<16x32xf32>
    %7 = arith.maximumf %5, %6 : vector<16x32xf32>
    %8 = arith.truncf %7 : vector<16x32xf32> to vector<16x32xbf16>
    %c0_6 = arith.constant 0 : index
    %c0_7 = arith.constant 0 : index
    %9 = vector.load %arg4[%c0_6, %c0_7] : memref<32x32xbf16, #tpu.memory_space<vmem>>, vector<32x32xbf16>
    %cst_8 = arith.constant dense<0.000000e+00> : vector<16x32xf32>
    %10 = tpu.matmul %8, %9, %cst_8 {dimension_numbers = #tpu.dot_dimension_numbers<[1], [0], [0], [1], [0, 0, 1, 1], [], []>} : vector<16x32xbf16>, vector<32x32xbf16>, vector<16x32xf32> -> vector<16x32xf32>
    %c0_9 = arith.constant 0 : index
    %c0_10 = arith.constant 0 : index
    %11 = vector.load %arg5[%c0_9, %c0_10] : memref<1x32xf32, #tpu.memory_space<vmem>>, vector<1x32xf32>
    %12 = vector.broadcast %11 : vector<1x32xf32> to vector<16x32xf32>
    %13 = arith.addf %10, %12 : vector<16x32xf32>
    %cst_11 = arith.constant 0.000000e+00 : f32
    %14 = vector.broadcast %cst_11 : f32 to vector<16x32xf32>
    %15 = arith.maximumf %13, %14 : vector<16x32xf32>
    %16 = arith.truncf %15 : vector<16x32xf32> to vector<16x32xbf16>
    %c0_12 = arith.constant 0 : index
    %c0_13 = arith.constant 0 : index
    %17 = vector.load %arg6[%c0_12, %c0_13] : memref<32x128xbf16, #tpu.memory_space<vmem>>, vector<32x128xbf16>
    %cst_14 = arith.constant dense<0.000000e+00> : vector<16x128xf32>
    %18 = tpu.matmul %16, %17, %cst_14 {dimension_numbers = #tpu.dot_dimension_numbers<[1], [0], [0], [1], [0, 0, 1, 1], [], []>} : vector<16x32xbf16>, vector<32x128xbf16>, vector<16x128xf32> -> vector<16x128xf32>
    %c0_15 = arith.constant 0 : index
    %c0_16 = arith.constant 0 : index
    %19 = vector.load %arg7[%c0_15, %c0_16] : memref<1x128xf32, #tpu.memory_space<vmem>>, vector<1x128xf32>
    %20 = vector.broadcast %19 : vector<1x128xf32> to vector<16x128xf32>
    %21 = arith.addf %18, %20 : vector<16x128xf32>
    %c0_17 = arith.constant 0 : index
    %c0_18 = arith.constant 0 : index
    %22 = vector.load %arg8[%c0_17, %c0_18] : memref<16x128xf32, #tpu.memory_space<vmem>>, vector<16x128xf32>
    tpu.vector_store %arg8[%c0_17, %c0_18], %21 {strides = array<i32>} : memref<16x128xf32, #tpu.memory_space<vmem>>, vector<16x128xf32>,
    return
  }
  func.func @transform_0(%arg0: i32) -> (i32, i32) {
    %c0_i32 = arith.constant 0 : i32
    %c0_i32_0 = arith.constant 0 : i32
    return %arg0, %c0_i32 : i32, i32
  }
  func.func @transform_1(%arg0: i32) -> (i32, i32) {
    %c0_i32 = arith.constant 0 : i32
    %c0_i32_0 = arith.constant 0 : i32
    %c0_i32_1 = arith.constant 0 : i32
    return %c0_i32, %c0_i32_0 : i32, i32
  }
  func.func @transform_2(%arg0: i32) -> (i32, i32) {
    %c0_i32 = arith.constant 0 : i32
    %c0_i32_0 = arith.constant 0 : i32
    %c0_i32_1 = arith.constant 0 : i32
    return %c0_i32, %c0_i32_0 : i32, i32
  }
  func.func @transform_3(%arg0: i32) -> (i32, i32) {
    %c0_i32 = arith.constant 0 : i32
    %c0_i32_0 = arith.constant 0 : i32
    %c0_i32_1 = arith.constant 0 : i32
    return %c0_i32, %c0_i32_0 : i32, i32
  }
  func.func @transform_4(%arg0: i32) -> (i32, i32) {
    %c0_i32 = arith.constant 0 : i32
    %c0_i32_0 = arith.constant 0 : i32
    %c0_i32_1 = arith.constant 0 : i32
    return %c0_i32, %c0_i32_0 : i32, i32
  }
  func.func @transform_5(%arg0: i32) -> (i32, i32) {
    %c0_i32 = arith.constant 0 : i32
    %c0_i32_0 = arith.constant 0 : i32
    %c0_i32_1 = arith.constant 0 : i32
    return %c0_i32, %c0_i32_0 : i32, i32
  }
  func.func @transform_6(%arg0: i32) -> (i32, i32) {
    %c0_i32 = arith.constant 0 : i32
    %c0_i32_0 = arith.constant 0 : i32
    %c0_i32_1 = arith.constant 0 : i32
    return %c0_i32, %c0_i32_0 : i32, i32
  }
  func.func @transform_7(%arg0: i32) -> (i32, i32) {
    %c0_i32 = arith.constant 0 : i32
    %c0_i32_0 = arith.constant 0 : i32
    return %arg0, %c0_i32 : i32, i32
  }
}

</mosaic_0001>

<bundles_post_ra>
// kernel: tpu_custom_call.1
= control target key start
LH: loop header
LB: loop body
LE: loop exit
PB: predicated region body
PF: predicated region fallthrough
CT: control target
= control target key end

     0   :  { %12 = vsyncpa [#allocation3], 0  ;;  %s568_s0 = inlined_call_operand.hbm [shape: bf16[16,16], index: 0, kind: input, shape index: {}]   ;;  %s569_s1 = inlined_call_operand.hbm [shape: bf16[16,32], index: 1, kind: input, shape index: {}]   ;;  %s570_s2 = inlined_call_operand.vmem [shape: f32[1,32], index: 2, kind: input, shape index: {}]   ;;  %s571_s3 = inlined_call_operand.hbm [shape: bf16[32,32], index: 3, kind: input, shape index: {}]   ;;  %s572_s4 = inlined_call_operand.vmem [shape: f32[1,32], index: 4, kind: input, shape index: {}]   ;;  %s573_s5 = inlined_call_operand.hbm [shape: bf16[32,128], index: 5, kind: input, shape index: {}]   ;;  %s574_s6 = inlined_call_operand.vmem [shape: f32[1,128], index: 6, kind: input, shape index: {}]   ;;  %s575_s7 = inlined_call_operand.hbm [shape: f32[16,128], index: 7, kind: output, shape index: {}]  }
   0x1   :  { %13 = vsyncpa [#allocation6], 0 }
   0x2   :  { %14 = vsyncpa [#allocation9], 0 }
   0x3   :  { %15 = vsyncpa [#allocation4], 0  ;;  %s479_s24 = smov [#allocation5]   ;;  %s480_s26 = smov [#allocation2]  }
   0x4   :  { %s33_s25 = sshll.u32 %s479_s24, 4  ;;  %s21_s27 = sshll.u32 %s480_s26, 4  ;;  %s34_s25 = int_to_ptr.vmem [resolvable:$true] %s33_s25  ;;  %s22_s27 = int_to_ptr.vmem [resolvable:$true] %s21_s27 }
   0x5   :  { %s379_s28 = scalar_lea.vmem %s34_s25, 128  ;;  %p384_p1 = scmp.lt.s32.totalorder %s34_s25, %s34_s25 }
   0x6   :  { %p380_p0 = scmp.ne.s32.totalorder %s34_s25, %s379_s28  ;;  %p385_p2 = scmp.lt.s32.totalorder %s379_s28, %s379_s28 }
   0x8   :  { %p386_p3 = por %p385_p2, %p384_p1 }
   0xa   :  { %p387_p4 = pnand %p386_p3, %p380_p0 }
   0xc   :  { %390 = shalt.err (!%p387_p4)
}
   0xd   :  { %s481_s29 = smov 64   ;;  %s482_s30 = smov 4  }
   0xe   :  { %39 = dma.hbm_to_vmem [thread:$0]  %s569_s1, 128, %s34_s25, [#allocation6], %s481_s29, %s481_s29, %s482_s30  }
   0xf   :  { %s399_s10 = scalar_lea.vmem %s22_s27, 128  ;;  %p404_p6 = scmp.lt.s32.totalorder %s22_s27, %s22_s27 }
  0x10   :  { %p400_p5 = scmp.ne.s32.totalorder %s22_s27, %s399_s10  ;;  %p405_p7 = scmp.lt.s32.totalorder %s399_s10, %s399_s10 }
  0x12   :  { %p406_p8 = por %p405_p7, %p404_p6 }
  0x14   :  { %p407_p9 = pnand %p406_p8, %p400_p5 }
  0x16   :  { %410 = shalt.err (!%p407_p9)
}
  0x17   :  { %27 = dma.hbm_to_vmem [thread:$0]  %s568_s0, 128, %s22_s27, [#allocation3], %s481_s29, %s481_s29, %s482_s30  }
  0x18   :  { %s483_s13 = smov [#allocation7]   ;;  %s484_s15 = smov [#allocation8]  }
  0x19   :  { %s47_s14 = sshll.u32 %s483_s13, 4  ;;  %s61_s16 = sshll.u32 %s484_s15, 4  ;;  %s48_s14 = int_to_ptr.vmem [resolvable:$true] %s47_s14  ;;  %s62_s16 = int_to_ptr.vmem [resolvable:$true] %s61_s16 }
  0x1a   :  { %s419_s1 = scalar_lea.vmem %s48_s14, 256  ;;  %p424_p11 = scmp.lt.s32.totalorder %s48_s14, %s48_s14 }
  0x1b   :  { %p420_p10 = scmp.ne.s32.totalorder %s48_s14, %s419_s1  ;;  %p425_p12 = scmp.lt.s32.totalorder %s419_s1, %s419_s1 }
  0x1d   :  { %p426_p13 = por %p425_p12, %p424_p11 }
  0x1f   :  { %p427_p0 = pnand %p426_p13, %p420_p10 }
  0x21   :  { %430 = shalt.err (!%p427_p0)
}
  0x22   :  { %53 = dma.hbm_to_vmem [thread:$0]  %s571_s3, 256, %s48_s14, [#allocation6], %s481_s29, %s481_s29, %s482_s30  }
  0x23   :  { %s439_s0 = scalar_lea.vmem %s62_s16, 256  ;;  %p444_p2 = scmp.lt.s32.totalorder %s62_s16, %s62_s16 }
  0x24   :  { %p440_p1 = scmp.ne.s32.totalorder %s62_s16, %s439_s0  ;;  %p445_p3 = scmp.lt.s32.totalorder %s439_s0, %s439_s0 }
  0x26   :  { %p446_p4 = por %p445_p3, %p444_p2 }
  0x28   :  { %p447_p5 = pnand %p446_p4, %p440_p1 }
  0x2a   :  { %450 = shalt.err (!%p447_p5)
}
  0x2b   :  { %67 = dma.hbm_to_vmem [thread:$0]  %s573_s5, 256, %s62_s16, [#allocation9], %s481_s29, %s481_s29, %s482_s30  }
  0x2c   :  { %471 = dma.done.wait [#allocation3], 128  }
  0x2d   :  { %472 = vsyncadd [#allocation3], 4294967168 }
  0x2e   :  { %473 = dma.done.wait [#allocation6], 384  }
  0x2f   :  { %474 = vsyncadd [#allocation6], 4294966912 }
  0x30   :  { %475 = dma.done.wait [#allocation9], 256  }
  0x31   :  { %476 = vsyncadd [#allocation9], 4294967040  ;;  %v485_v0 = vmov 0.0   ;;  %vm486_vm0 = vmmov 0   ;;  %v365_v1 = vld [vmem:[#allocation5] sm:$0xff]   ;;  %v366_v2 = vld [vmem:[#allocation2] sm:$0xff]  }
  0x32   :  { %332 = vmatprep.subr.bf16.mxu0 %v485_v0  ;;  %334 = vmatprep.mubr.msk.bf16.mxu0 %vm486_vm0, %v485_v0  ;;  %vm105_vm1 = vcmask 130048   ;;  %v367_v3 = vld [vmem:[#allocation7 + $0x8] sm:$0xff]   ;;  %v368_v4 = vld [vmem:[#allocation7] sm:$0xff]   ;;  %v312_v5 = vld [vmem:[%s570_s2] ss:$0 sm:$0xff]  ;;  %vm176_vm2 = vcmask 261120  }
  0x33   :  { %338 = vmatprep.subr.bf16.mxu1 %v485_v0  ;;  %342 = vmatprep.mubr.msk.bf16.mxu1 %vm486_vm0, %v485_v0  ;;  %v369_v15 = vld [vmem:[#allocation8 + $0x8] sm:$0xff]   ;;  %v370_v16 = vld [vmem:[#allocation8] sm:$0xff]   ;;  %s487_s24 = smov [#allocation10]  }
  0x34   :  { %333 = vmatpush3.bf16.msra.mxu0 %v365_v1  ;;  %339 = vmatpush3.bf16.msra.mxu1 %v367_v3  ;;  %v316_v17 = vld [vmem:[%s572_s4] ss:$0 sm:$0xff]  ;;  %s298_s25 = sshll.u32 %s487_s24, 4  ;;  %s299_s25 = int_to_ptr.vmem [resolvable:$true] %s298_s25 }
  0x35   :  { %346 = vmatprep.subr.bf16.mxu0 %v485_v0  ;;  %340 = vmatprep.subr.bf16.mxu1 %v485_v0  ;;  %v320_v27 = vld [vmem:[%s574_s6] ss:$0 sm:$0xff]  ;;  %s451_s4 = scalar_lea.vmem %s299_s25, 256  ;;  %p456_p7 = scmp.lt.s32.totalorder %s299_s25, %s299_s25 }
  0x36   :  { %p452_p6 = scmp.ne.s32.totalorder %s299_s25, %s451_s4  ;;  %p457_p8 = scmp.lt.s32.totalorder %s451_s4, %s451_s4 }
  0x37   :  { %335 = vmatmul.mubr.msk.bf16.vlgmr.msra.gmra.mxu0 %vm105_vm1, %v366_v2 }
  0x38   :  { %350 = vmatprep.mubr.msk.bf16.mxu0 %vm486_vm0, %v485_v0  ;;  %341 = vmatpush3.bf16.msra.mxu1 %v368_v4  ;;  %p458_p9 = por %p457_p8, %p456_p7 }
  0x39   :  { %347 = vmatpush3.bf16.msra.mxu0 %v369_v15 }
  0x3a   :  { %348 = vmatprep.subr.bf16.mxu0 %v485_v0  ;;  %p459_p10 = pnand %p458_p9, %p452_p6 }
  0x3d   :  { %349 = vmatpush3.bf16.msra.mxu0 %v370_v16 }
  0xf7   :  { %v143_v6 = vpop.f32.mrf.mxu0 }
  0xf8   :  { %v144_v8 = vadd.f32 %v312_v5, %v143_v6 }
  0xf9   :  { %v336_v7 = vpop.f32.mrf.mxu0 }
  0xfa   :  { %v150_v12 = vmax.f32 %v144_v8, 0.0 }
  0xfb   :  { %v146_v9 = vpop.f32.mrf.mxu0 }
  0xfc   :  { %v147_v10 = vadd.f32 %v312_v5, %v146_v9 }
  0xfd   :  { %v337_v11 = vpop.f32.mrf.mxu0 }
  0xfe   :  { %v151_v13 = vmax.f32 %v147_v10, 0.0 }
 0x100   :  { %v152_v14 = vpack.c.bf16 %v151_v13, %v150_v12 }
 0x102   :  { %343 = vmatmul.mubr.msk.bf16.vlgmr.msra.gmra.mxu1 %vm176_vm2, %v152_v14 }
 0x1c2   :  { %v214_v18 = vpop.f32.mrf.mxu1 }
 0x1c3   :  { %v215_v20 = vadd.f32 %v316_v17, %v214_v18 }
 0x1c4   :  { %v344_v19 = vpop.f32.mrf.mxu1 }
 0x1c5   :  { %v221_v24 = vmax.f32 %v215_v20, 0.0 }
 0x1c6   :  { %v217_v21 = vpop.f32.mrf.mxu1 }
 0x1c7   :  { %v218_v22 = vadd.f32 %v316_v17, %v217_v21 }
 0x1c8   :  { %v345_v23 = vpop.f32.mrf.mxu1 }
 0x1c9   :  { %v222_v25 = vmax.f32 %v218_v22, 0.0 }
 0x1cb   :  { %v223_v26 = vpack.c.bf16 %v222_v25, %v221_v24 }
 0x1cd   :  { %351 = vmatmul.mubr.msk.bf16.vlgmr.msra.gmra.mxu0 %vm176_vm2, %v223_v26 }
 0x28d   :  { %v284_v28 = vpop.f32.mrf.mxu0 }
 0x28e   :  { %v285_v29 = vadd.f32 %v320_v27, %v284_v28 }
 0x28f   :  { %v352_v30 = vpop.f32.mrf.mxu0 }
 0x290   :  { %291 = vst [vmem:[#allocation10] sm:$0xff] %v285_v29 }
 0x291   :  { %v287_v31 = vpop.f32.mrf.mxu0 }
 0x292   :  { %v288_v32 = vadd.f32 %v320_v27, %v287_v31 }
 0x293   :  { %v353_v33 = vpop.f32.mrf.mxu0 }
 0x294   :  { %292 = vst [vmem:[#allocation10 + $0x8] sm:$0xff] %v288_v32 }
 0x295   :  { %462 = shalt.err (!%p459_p10)
}
 0x296   :  { %s488_s26 = smov 128   ;;  %s489_s6 = smov 8  }
 0x297   :  { %304 = dma.vmem_to_hbm [thread:$0]  %s299_s25, 256, %s575_s7, [#allocation4], %s488_s26, %s488_s26, %s489_s6  }
 0x298   :  { %477 = dma.done.wait [#allocation4], 256  }
 0x299   :  { %478 = vsyncadd [#allocation4], 4294967040 }
 0x29a   :  { %308 = vsyncpa [#allocation3], 1 }
 0x29b   :  { %309 = vsyncpa [#allocation6], 1 }
 0x29c   :  { %310 = vsyncpa [#allocation9], 1 }
 0x29d   :  { %311 = vsyncpa [#allocation4], 1 }

</bundles_post_ra>
